<compile_context>
chip_gen: v5e
topology: v5e:2x2
jax: 0.10.0
libtpu: 0.0.40
codegen_flags: <defaults>
</compile_context>

<pallas_src>
import functools

import jax
import jax.numpy as jnp
from jax.experimental import pallas as pl
from jax.experimental.pallas import tpu as pltpu

WIDTH = 64
OUT = 2

_SQRT_2_OVER_PI = 0.7978845608028654


def _gelu_tanh(x):
    # tanh-approximate GELU (PyTorch nn.GELU(approximate='tanh')).
    # Transcendental goes to the EUP bundle slot; polynomial stays on the VPU.
    return 0.5 * x * (1.0 + jnp.tanh(_SQRT_2_OVER_PI * (x + 0.044715 * (x * x * x))))


def mlp_kernel(x_ref, w1_ref, b1_ref, w2_ref, b2_ref, w3_ref, b3_ref, o_ref, *, act_dtype):
    # x: (TB, 64) f32 -> bf16 for the MXU (cast kept in-kernel; weights arrive bf16).
    x = x_ref[...].astype(jnp.bfloat16)

    # lay1 + GELU  (bf16 operands, f32 accumulate + f32 bias; GELU in act_dtype)
    h = jnp.dot(x, w1_ref[...], preferred_element_type=jnp.float32) + b1_ref[...]
    h = _gelu_tanh(h.astype(act_dtype)).astype(jnp.bfloat16)

    # lay2 + GELU
    h = jnp.dot(h, w2_ref[...], preferred_element_type=jnp.float32) + b2_ref[...]
    h = _gelu_tanh(h.astype(act_dtype)).astype(jnp.bfloat16)

    # lay3 + softmax(dim=1), folded into a per-class sigmoid of +/- the logit diff:
    #   logits = h @ [w3d, -w3d] + [b3d, -b3d]   (w3d = w3[:,0]-w3[:,1])
    #   softmax(orig_logits) == [sigmoid(d), sigmoid(-d)]  for 2 classes.
    logits = jnp.dot(h, w3_ref[...], preferred_element_type=jnp.float32) + b3_ref[...]  # (TB, 2)
    p = pl.reciprocal(1.0 + jnp.exp(-logits), approx=True)  # EUP reciprocal (approx)
    o_ref[...] = p.astype(o_ref.dtype)


def _round_up(n, m):
    return ((n + m - 1) // m) * m


def _cdiv(a, b):
    return -(-a // b)


def _default_act_dtype():
    # bf16 elementwise math only where the VPU/EUP are bf16-native (v6e / v7x).
    try:
        kind = jax.devices()[0].device_kind.lower()
    except Exception:
        return jnp.float32
    if any(v in kind for v in ("v2", "v3", "v4", "v5")):
        return jnp.float32
    return jnp.bfloat16


def nn_model_forward(x, params, block_b=4096, act_dtype=None):
    """Forward pass. x: (B, 64) f32. Weights pre-transposed to (in, out)."""
    if act_dtype is None:
        act_dtype = _default_act_dtype()

    w1, b1, w2, b2, w3, b3 = params
    B = x.shape[0]

    # --- one-time weight prep (outside the kernel) ---------------------------
    w1b = w1.astype(jnp.bfloat16)
    w2b = w2.astype(jnp.bfloat16)
    w3d = w3[:, 0:1] - w3[:, 1:2]                       # (64, 1)
    b3d = b3[:, 0:1] - b3[:, 1:2]                       # (1, 1)
    w3pm = jnp.concatenate([w3d, -w3d], axis=1).astype(jnp.bfloat16)  # (64, 2)
    b3pm = jnp.concatenate([b3d, -b3d], axis=1)                        # (1, 2) f32

    # --- batch tiling: even split, multiple of 8 sublanes, even grid if B>=16 -
    num_blocks = max(1, _cdiv(B, block_b))
    if B >= 16:
        num_blocks = _round_up(num_blocks, 2)           # keep both v7x TCs busy
    tb = _round_up(_cdiv(B, num_blocks), 8)
    grid_n = _cdiv(B, tb)
    b_padded = grid_n * tb
    if b_padded != B:
        x = jnp.pad(x, ((0, b_padded - B), (0, 0)))     # zero rows, sliced off below

    kernel = functools.partial(mlp_kernel, act_dtype=act_dtype)

    out = pl.pallas_call(
        kernel,
        out_shape=jax.ShapeDtypeStruct((b_padded, OUT), jnp.float32),
        grid=(grid_n,),
        in_specs=[
            pl.BlockSpec((tb, WIDTH), lambda i: (i, 0)),        # x: streamed per batch tile
            pl.BlockSpec((WIDTH, WIDTH), lambda i: (0, 0)),     # w1 (bf16, grid-invariant)
            pl.BlockSpec((1, WIDTH), lambda i: (0, 0)),         # b1 (f32)
            pl.BlockSpec((WIDTH, WIDTH), lambda i: (0, 0)),     # w2 (bf16)
            pl.BlockSpec((1, WIDTH), lambda i: (0, 0)),         # b2 (f32)
            pl.BlockSpec((WIDTH, OUT), lambda i: (0, 0)),       # w3 +/- concat (bf16)
            pl.BlockSpec((1, OUT), lambda i: (0, 0)),           # b3 +/- concat (f32)
        ],
        out_specs=pl.BlockSpec((tb, OUT), lambda i: (i, 0)),
        compiler_params=pltpu.CompilerParams(
            dimension_semantics=("parallel",),  # megacore split on v7x; no-op on v5e/v6e
        ),
    )(x, w1b, b1, w2b, b2, w3pm, b3pm)

    return out[:B] if b_padded != B else out


def init_params(key):
    # Deterministic init mimicking torch.nn.Linear's uniform(-1/sqrt(in), 1/sqrt(in)).
    k1, k2, k3, k4, k5, k6 = jax.random.split(key, 6)
    lim1 = 1.0 / jnp.sqrt(64.0)
    lim2 = 1.0 / jnp.sqrt(float(WIDTH))
    # Stored pre-transposed: (in, out)
    w1 = jax.random.uniform(k1, (64, WIDTH), jnp.float32, -lim1, lim1)
    b1 = jax.random.uniform(k2, (1, WIDTH), jnp.float32, -lim1, lim1)
    w2 = jax.random.uniform(k3, (WIDTH, WIDTH), jnp.float32, -lim2, lim2)
    b2 = jax.random.uniform(k4, (1, WIDTH), jnp.float32, -lim2, lim2)
    w3 = jax.random.uniform(k5, (WIDTH, OUT), jnp.float32, -lim2, lim2)
    b3 = jax.random.uniform(k6, (1, OUT), jnp.float32, -lim2, lim2)
    return (w1, b1, w2, b2, w3, b3)


def reference_forward(x, params):
    # Exact f32 reference matching the PyTorch module (erf GELU, true softmax).
    w1, b1, w2, b2, w3, b3 = params
    h = jax.nn.gelu(x @ w1 + b1, approximate=False)
    h = jax.nn.gelu(h @ w2 + b2, approximate=False)
    logits = h @ w3 + b3
    return jax.nn.softmax(logits, axis=1)


if __name__ == "__main__":
    key = jax.random.PRNGKey(0)
    kx, kp, kx2 = jax.random.split(key, 3)
    params = init_params(kp)

    # Small case (single tile).
    B = 8
    x = jax.random.normal(kx, (B, 64), jnp.float32)
    out = jax.block_until_ready(nn_model_forward(x, params))
    ref = reference_forward(x, params)
    assert out.shape == (B, OUT)
    # bf16 matmul operands / bf16 elementwise (v6e+/v7x) / tanh GELU / approx
    # reciprocal => relaxed tolerance vs the exact-f32 erf-GELU reference.
    assert jnp.allclose(out, ref, atol=3e-2, rtol=0.0), "mismatch vs reference (small)"
    assert jnp.allclose(jnp.sum(out, axis=1), 1.0, atol=1e-2), "softmax rows must sum to ~1"

    # Larger case: exercises multi-block grid (even split -> 2 tiles), padding and
    # the parallel batch axis.
    B2 = 2500
    x2 = jax.random.normal(kx2, (B2, 64), jnp.float32)
    out2 = jax.block_until_ready(nn_model_forward(x2, params))
    ref2 = reference_forward(x2, params)
    assert out2.shape == (B2, OUT)
    assert jnp.allclose(out2, ref2, atol=3e-2, rtol=0.0), "mismatch vs reference (gridded)"
    assert jnp.allclose(jnp.sum(out2, axis=1), 1.0, atol=1e-2), "softmax rows must sum to ~1"

    print("KERNEL_OK")
</pallas_src>

<mosaic_0001>
module attributes {stable_mosaic.version = 11 : i64} {
  func.func @mlp_kernel(%arg0: i32, %arg1: memref<8x64xf32, #tpu.memory_space<vmem>>, %arg2: memref<64x64xbf16, #tpu.memory_space<vmem>>, %arg3: memref<1x64xf32, #tpu.memory_space<vmem>>, %arg4: memref<64x64xbf16, #tpu.memory_space<vmem>>, %arg5: memref<1x64xf32, #tpu.memory_space<vmem>>, %arg6: memref<64x2xbf16, #tpu.memory_space<vmem>>, %arg7: memref<1x2xf32, #tpu.memory_space<vmem>>, %arg8: memref<8x2xf32, #tpu.memory_space<vmem>>) attributes {dimension_semantics = [#tpu.dimension_semantics<parallel>], iteration_bounds = array<i64: 1>, scalar_prefetch = 0 : i64, scratch_operands = 0 : i64, tpu.core_type = #tpu.core_type<tc>, window_params = [{transform_indices = @transform_0, window_bounds = array<i64: 8, 64>}, {pipeline_mode = #tpu.pipeline_mode<synchronous>, transform_indices = @transform_1, window_bounds = array<i64: 64, 64>}, {pipeline_mode = #tpu.pipeline_mode<synchronous>, transform_indices = @transform_2, window_bounds = array<i64: 1, 64>}, {pipeline_mode = #tpu.pipeline_mode<synchronous>, transform_indices = @transform_3, window_bounds = array<i64: 64, 64>}, {pipeline_mode = #tpu.pipeline_mode<synchronous>, transform_indices = @transform_4, window_bounds = array<i64: 1, 64>}, {pipeline_mode = #tpu.pipeline_mode<synchronous>, transform_indices = @transform_5, window_bounds = array<i64: 64, 2>}, {pipeline_mode = #tpu.pipeline_mode<synchronous>, transform_indices = @transform_6, window_bounds = array<i64: 1, 2>}, {transform_indices = @transform_7, window_bounds = array<i64: 8, 2>}]} {
    %c0 = arith.constant 0 : index
    %c0_0 = arith.constant 0 : index
    %0 = vector.load %arg1[%c0, %c0_0] : memref<8x64xf32, #tpu.memory_space<vmem>>, vector<8x64xf32>
    %1 = arith.truncf %0 : vector<8x64xf32> to vector<8x64xbf16>
    %c0_1 = arith.constant 0 : index
    %c0_2 = arith.constant 0 : index
    %2 = vector.load %arg2[%c0_1, %c0_2] : memref<64x64xbf16, #tpu.memory_space<vmem>>, vector<64x64xbf16>
    %cst = arith.constant dense<0.000000e+00> : vector<8x64xf32>
    %3 = tpu.matmul %1, %2, %cst {dimension_numbers = #tpu.dot_dimension_numbers<[1], [0], [0], [1], [0, 0, 1, 1], [], []>} : vector<8x64xbf16>, vector<64x64xbf16>, vector<8x64xf32> -> vector<8x64xf32>
    %c0_3 = arith.constant 0 : index
    %c0_4 = arith.constant 0 : index
    %4 = vector.load %arg3[%c0_3, %c0_4] : memref<1x64xf32, #tpu.memory_space<vmem>>, vector<1x64xf32>
    %5 = vector.broadcast %4 : vector<1x64xf32> to vector<8x64xf32>
    %6 = arith.addf %3, %5 : vector<8x64xf32>
    %7 = arith.truncf %6 : vector<8x64xf32> to vector<8x64xbf16>
    %cst_5 = arith.constant 5.000000e-01 : bf16
    %8 = vector.broadcast %cst_5 : bf16 to vector<8x64xbf16>
    %9 = arith.mulf %8, %7 : vector<8x64xbf16>
    %10 = arith.mulf %7, %7 : vector<8x64xbf16>
    %11 = arith.mulf %10, %7 : vector<8x64xbf16>
    %cst_6 = arith.constant 4.467770e-02 : bf16
    %12 = vector.broadcast %cst_6 : bf16 to vector<8x64xbf16>
    %13 = arith.mulf %12, %11 : vector<8x64xbf16>
    %14 = arith.addf %7, %13 : vector<8x64xbf16>
    %cst_7 = arith.constant 7.968750e-01 : bf16
    %15 = vector.broadcast %cst_7 : bf16 to vector<8x64xbf16>
    %16 = arith.mulf %15, %14 : vector<8x64xbf16>
    %17 = math.tanh %16 : vector<8x64xbf16>
    %cst_8 = arith.constant 1.000000e+00 : bf16
    %18 = vector.broadcast %cst_8 : bf16 to vector<8x64xbf16>
    %19 = arith.addf %18, %17 : vector<8x64xbf16>
    %20 = arith.mulf %9, %19 : vector<8x64xbf16>
    %c0_9 = arith.constant 0 : index
    %c0_10 = arith.constant 0 : index
    %21 = vector.load %arg4[%c0_9, %c0_10] : memref<64x64xbf16, #tpu.memory_space<vmem>>, vector<64x64xbf16>
    %cst_11 = arith.constant dense<0.000000e+00> : vector<8x64xf32>
    %22 = tpu.matmul %20, %21, %cst_11 {dimension_numbers = #tpu.dot_dimension_numbers<[1], [0], [0], [1], [0, 0, 1, 1], [], []>} : vector<8x64xbf16>, vector<64x64xbf16>, vector<8x64xf32> -> vector<8x64xf32>
    %c0_12 = arith.constant 0 : index
    %c0_13 = arith.constant 0 : index
    %23 = vector.load %arg5[%c0_12, %c0_13] : memref<1x64xf32, #tpu.memory_space<vmem>>, vector<1x64xf32>
    %24 = vector.broadcast %23 : vector<1x64xf32> to vector<8x64xf32>
    %25 = arith.addf %22, %24 : vector<8x64xf32>
    %26 = arith.truncf %25 : vector<8x64xf32> to vector<8x64xbf16>
    %cst_14 = arith.constant 5.000000e-01 : bf16
    %27 = vector.broadcast %cst_14 : bf16 to vector<8x64xbf16>
    %28 = arith.mulf %27, %26 : vector<8x64xbf16>
    %29 = arith.mulf %26, %26 : vector<8x64xbf16>
    %30 = arith.mulf %29, %26 : vector<8x64xbf16>
    %cst_15 = arith.constant 4.467770e-02 : bf16
    %31 = vector.broadcast %cst_15 : bf16 to vector<8x64xbf16>
    %32 = arith.mulf %31, %30 : vector<8x64xbf16>
    %33 = arith.addf %26, %32 : vector<8x64xbf16>
    %cst_16 = arith.constant 7.968750e-01 : bf16
    %34 = vector.broadcast %cst_16 : bf16 to vector<8x64xbf16>
    %35 = arith.mulf %34, %33 : vector<8x64xbf16>
    %36 = math.tanh %35 : vector<8x64xbf16>
    %cst_17 = arith.constant 1.000000e+00 : bf16
    %37 = vector.broadcast %cst_17 : bf16 to vector<8x64xbf16>
    %38 = arith.addf %37, %36 : vector<8x64xbf16>
    %39 = arith.mulf %28, %38 : vector<8x64xbf16>
    %c0_18 = arith.constant 0 : index
    %c0_19 = arith.constant 0 : index
    %40 = vector.load %arg6[%c0_18, %c0_19] : memref<64x2xbf16, #tpu.memory_space<vmem>>, vector<64x2xbf16>
    %cst_20 = arith.constant dense<0.000000e+00> : vector<8x2xf32>
    %41 = tpu.matmul %39, %40, %cst_20 {dimension_numbers = #tpu.dot_dimension_numbers<[1], [0], [0], [1], [0, 0, 1, 1], [], []>} : vector<8x64xbf16>, vector<64x2xbf16>, vector<8x2xf32> -> vector<8x2xf32>
    %c0_21 = arith.constant 0 : index
    %c0_22 = arith.constant 0 : index
    %42 = vector.load %arg7[%c0_21, %c0_22] : memref<1x2xf32, #tpu.memory_space<vmem>>, vector<1x2xf32>
    %43 = vector.broadcast %42 : vector<1x2xf32> to vector<8x2xf32>
    %44 = arith.addf %41, %43 : vector<8x2xf32>
    %cst_23 = arith.constant 0.000000e+00 : f32
    %45 = vector.broadcast %cst_23 : f32 to vector<8x2xf32>
    %46 = arith.subf %45, %44 : vector<8x2xf32>
    %47 = math.exp %46 : vector<8x2xf32>
    %cst_24 = arith.constant 1.000000e+00 : f32
    %48 = vector.broadcast %cst_24 : f32 to vector<8x2xf32>
    %49 = arith.addf %48, %47 : vector<8x2xf32>
    %50 = tpu.reciprocal %49 {approx = true} : vector<8x2xf32> -> vector<8x2xf32>
    %c0_25 = arith.constant 0 : index
    %c0_26 = arith.constant 0 : index
    %51 = vector.load %arg8[%c0_25, %c0_26] : memref<8x2xf32, #tpu.memory_space<vmem>>, vector<8x2xf32>
    tpu.vector_store %arg8[%c0_25, %c0_26], %50 {strides = array<i32>} : memref<8x2xf32, #tpu.memory_space<vmem>>, vector<8x2xf32>,
    return
  }
  func.func @transform_0(%arg0: i32) -> (i32, i32) {
    %c0_i32 = arith.constant 0 : i32
    %c0_i32_0 = arith.constant 0 : i32
    return %arg0, %c0_i32 : i32, i32
  }
  func.func @transform_1(%arg0: i32) -> (i32, i32) {
    %c0_i32 = arith.constant 0 : i32
    %c0_i32_0 = arith.constant 0 : i32
    %c0_i32_1 = arith.constant 0 : i32
    return %c0_i32, %c0_i32_0 : i32, i32
  }
  func.func @transform_2(%arg0: i32) -> (i32, i32) {
    %c0_i32 = arith.constant 0 : i32
    %c0_i32_0 = arith.constant 0 : i32
    %c0_i32_1 = arith.constant 0 : i32
    return %c0_i32, %c0_i32_0 : i32, i32
  }
  func.func @transform_3(%arg0: i32) -> (i32, i32) {
    %c0_i32 = arith.constant 0 : i32
    %c0_i32_0 = arith.constant 0 : i32
    %c0_i32_1 = arith.constant 0 : i32
    return %c0_i32, %c0_i32_0 : i32, i32
  }
  func.func @transform_4(%arg0: i32) -> (i32, i32) {
    %c0_i32 = arith.constant 0 : i32
    %c0_i32_0 = arith.constant 0 : i32
    %c0_i32_1 = arith.constant 0 : i32
    return %c0_i32, %c0_i32_0 : i32, i32
  }
  func.func @transform_5(%arg0: i32) -> (i32, i32) {
    %c0_i32 = arith.constant 0 : i32
    %c0_i32_0 = arith.constant 0 : i32
    %c0_i32_1 = arith.constant 0 : i32
    return %c0_i32, %c0_i32_0 : i32, i32
  }
  func.func @transform_6(%arg0: i32) -> (i32, i32) {
    %c0_i32 = arith.constant 0 : i32
    %c0_i32_0 = arith.constant 0 : i32
    %c0_i32_1 = arith.constant 0 : i32
    return %c0_i32, %c0_i32_0 : i32, i32
  }
  func.func @transform_7(%arg0: i32) -> (i32, i32) {
    %c0_i32 = arith.constant 0 : i32
    %c0_i32_0 = arith.constant 0 : i32
    return %arg0, %c0_i32 : i32, i32
  }
}

</mosaic_0001>

<bundles_post_ra>
// kernel: tpu_custom_call.1
= control target key start
LH: loop header
LB: loop body
LE: loop exit
PB: predicated region body
PF: predicated region fallthrough
CT: control target
= control target key end

     0   :  { %12 = vsyncpa [#allocation3], 0  ;;  %s504_s0 = inlined_call_operand.hbm [shape: f32[8,64], index: 0, kind: input, shape index: {}]   ;;  %s505_s1 = inlined_call_operand.vmem [shape: bf16[64,64], index: 1, kind: input, shape index: {}]   ;;  %s506_s2 = inlined_call_operand.vmem [shape: f32[1,64], index: 2, kind: input, shape index: {}]   ;;  %s507_s3 = inlined_call_operand.hbm [shape: bf16[64,64], index: 3, kind: input, shape index: {}]   ;;  %s508_s4 = inlined_call_operand.vmem [shape: f32[1,64], index: 4, kind: input, shape index: {}]   ;;  %s509_s5 = inlined_call_operand.vmem [shape: bf16[64,2], index: 5, kind: input, shape index: {}]   ;;  %s510_s6 = inlined_call_operand.vmem [shape: f32[1,2], index: 6, kind: input, shape index: {}]   ;;  %s511_s7 = inlined_call_operand.vmem [shape: f32[8,2], index: 7, kind: output, shape index: {}]  }
   0x1   :  { %s19_s26 = sshll.u32 %s504_s0, 4  ;;  %s20_s26 = int_to_ptr.hbm [resolvable:$true] %s19_s26 }
   0x2   :  { %13 = vsyncpa [#allocation5], 0  ;;  %s415_s27 = smov [#allocation2]   ;;  %s33_s8 = sshll.u32 %s507_s3, 4  ;;  %s34_s8 = int_to_ptr.hbm [resolvable:$true] %s33_s8 }
   0x3   :  { %s21_s28 = sshll.u32 %s415_s27, 4  ;;  %s416_s9 = smov [#allocation4]   ;;  %s22_s28 = int_to_ptr.vmem [resolvable:$true] %s21_s28 }
   0x4   :  { %24 = dma.hbm_to_vmem [thread:$0]  %s20_s26, 128, %s22_s28, [#allocation3]  }
   0x5   :  { %s35_s10 = sshll.u32 %s416_s9, 4  ;;  %s417_s11 = smov 64   ;;  %s36_s10 = int_to_ptr.vmem [resolvable:$true] %s35_s10 }
   0x6   :  { %s418_s12 = smov 4  }
   0x7   :  { %41 = dma.hbm_to_vmem [thread:$0]  %s34_s8, 512, %s36_s10, [#allocation5], %s417_s11, %s417_s11, %s418_s12  }
   0x8   :  { %411 = dma.done.wait [#allocation3], 128  }
   0x9   :  { %412 = vsyncadd [#allocation3], 4294967168 }
   0xa   :  { %413 = dma.done.wait [#allocation5], 512  }
   0xb   :  { %414 = vsyncadd [#allocation5], 4294966784  ;;  %v339_v0 = vld [vmem:[%s505_s1 + $0x18] sm:$0xff]  ;;  %v338_v1 = vld [vmem:[%s505_s1 + $0x10] sm:$0xff]  ;;  %vm95_vm0 = vcmask 523264   ;;  %vm277_vm1 = vcmask 15360  }
   0xc   :  { %103 = vmatpush.bf16.msra.mxu0 %v339_v0  ;;  %v337_v2 = vld [vmem:[%s505_s1 + $0x8] sm:$0xff]  ;;  %v336_v3 = vld [vmem:[%s505_s1] sm:$0xff]  ;;  %v342_v10 = vld [vmem:[#allocation4 + $0x10] sm:$0xff] }
   0xd   :  { %v57_v4 = vld [vmem:[#allocation2] sm:$0xff]  ;;  %v341_v13 = vld [vmem:[#allocation4 + $0x8] sm:$0xff]  ;;  %v340_v17 = vld [vmem:[#allocation4] sm:$0xff] }
   0xe   :  { %v58_v5 = vpack.c.bf16 %v57_v4, %v57_v4  ;;  %v352_v6 = vld [vmem:[%s506_s2] ss:$0 sm:$0xff]  ;;  %v347_v43 = vld [vmem:[%s509_s5 + $0x18] sm:$0xff]  ;;  %v346_v46 = vld [vmem:[%s509_s5 + $0x10] sm:$0xff] }
   0xf   :  { %v343_v7 = vld [vmem:[#allocation4 + $0x18] sm:$0xff]  ;;  %263 = vmatpush.bf16.msra.mxu2 %v347_v43  ;;  %v345_v49 = vld [vmem:[%s509_s5 + $0x8] sm:$0xff] }
  0x10   :  { %104 = vmatpush.bf16.msra.mxu0 %v338_v1  ;;  %183 = vmatpush.bf16.msra.mxu1 %v343_v7  ;;  %v353_v42 = vld [vmem:[%s508_s4] ss:$0 sm:$0xff] }
  0x11   :  { %v344_v53 = vld [vmem:[%s509_s5] sm:$0xff] }
  0x13   :  { %264 = vmatpush.bf16.msra.mxu2 %v346_v46 }
  0x14   :  { %105 = vmatpush.bf16.msra.mxu0 %v337_v2  ;;  %184 = vmatpush.bf16.msra.mxu1 %v342_v10 }
  0x17   :  { %265 = vmatpush.bf16.msra.mxu2 %v345_v49 }
  0x18   :  { %106 = vmatpush.bf16.msra.mxu0 %v336_v3  ;;  %185 = vmatpush.bf16.msra.mxu1 %v341_v13 }
  0x1b   :  { %301 = vmatmul.msk.bf16.vlgmr.msra.gmra.mxu0 %vm95_vm0, %v58_v5  ;;  %266 = vmatpush.bf16.msra.mxu2 %v344_v53 }
  0x1c   :  { %186 = vmatpush.bf16.msra.mxu1 %v340_v17 }
  0x98   :  { %v108_v8 = vpop.f32.mrf.mxu0 }
  0x99   :  { %v109_v9 = vadd.f32 %v352_v6, %v108_v8 }
  0x9b   :  { %v112_v11 = vpack.c.bf16 %v109_v9, %v109_v9 }
  0x9d   :  { %v113_v12 = vunpack.c.l.bf16 %v112_v11 }
  0x9f   :  { %v116_v14 = vmul.f32 %v113_v12, %v113_v12  ;;  %v114_v32 = vmul.f32 0.5, %v113_v12 }
  0xa0   :  { %v110_v15 = vpop.f32.mrf.mxu0 }
  0xa1   :  { %v117_v16 = vpack.c.bf16 %v116_v14, %v116_v14  ;;  %v115_v35 = vpack.c.bf16 %v114_v32, %v114_v32  ;;  %v354_v14 = vld [vmem:[%s510_s6] ss:$0 sm:$0xff] }
  0xa3   :  { %v118_v18 = vunpack.c.l.bf16 %v117_v16  ;;  %v136_v38 = vunpack.c.l.bf16 %v115_v35 }
  0xa5   :  { %v119_v19 = vmul.f32 %v118_v18, %v113_v12 }
  0xa7   :  { %v120_v20 = vpack.c.bf16 %v119_v19, %v119_v19 }
  0xa9   :  { %v121_v21 = vunpack.c.l.bf16 %v120_v20 }
  0xab   :  { %v122_v22 = vmul.f32 0.044677734, %v121_v21 }
  0xad   :  { %v123_v23 = vpack.c.bf16 %v122_v22, %v122_v22 }
  0xaf   :  { %v124_v24 = vunpack.c.l.bf16 %v123_v23 }
  0xb1   :  { %v125_v25 = vadd.f32 %v124_v24, %v113_v12 }
  0xb3   :  { %v126_v26 = vpack.c.bf16 %v125_v25, %v125_v25 }
  0xb5   :  { %v127_v27 = vunpack.c.l.bf16 %v126_v26 }
  0xb7   :  { %v128_v28 = vmul.f32 0.796875, %v127_v27 }
  0xb9   :  { %v129_v29 = vpack.c.bf16 %v128_v28, %v128_v28 }
  0xbb   :  { %v130_v30 = vunpack.c.l.bf16 %v129_v29 }
  0xbd   :  { %355 = vtanh.f32 %v130_v30 }
  0xc3   :  { %v356_v31 = vpop.eup %355 }
  0xc4   :  { %v132_v33 = vpack.c.bf16 %v356_v31, %v356_v31 }
  0xc6   :  { %v133_v34 = vunpack.c.l.bf16 %v132_v33 }
  0xc8   :  { %v134_v36 = vadd.f32 1.0, %v133_v34 }
  0xca   :  { %v135_v37 = vpack.c.bf16 %v134_v36, %v134_v36 }
  0xcc   :  { %v137_v39 = vunpack.c.l.bf16 %v135_v37 }
  0xce   :  { %v138_v40 = vmul.f32 %v137_v39, %v136_v38 }
  0xd0   :  { %v139_v41 = vpack.c.bf16 %v138_v40, %v138_v40 }
  0xd2   :  { %318 = vmatmul.msk.bf16.vlgmr.msra.gmra.mxu1 %vm95_vm0, %v139_v41 }
 0x14f   :  { %v188_v44 = vpop.f32.mrf.mxu1 }
 0x150   :  { %v189_v45 = vadd.f32 %v353_v42, %v188_v44 }
 0x152   :  { %v192_v47 = vpack.c.bf16 %v189_v45, %v189_v45 }
 0x154   :  { %v193_v48 = vunpack.c.l.bf16 %v192_v47 }
 0x156   :  { %v196_v50 = vmul.f32 %v193_v48, %v193_v48  ;;  %v194_v4 = vmul.f32 0.5, %v193_v48 }
 0x157   :  { %v190_v51 = vpop.f32.mrf.mxu1 }
 0x158   :  { %v197_v52 = vpack.c.bf16 %v196_v50, %v196_v50  ;;  %v195_v7 = vpack.c.bf16 %v194_v4, %v194_v4 }
 0x15a   :  { %v198_v54 = vunpack.c.l.bf16 %v197_v52  ;;  %v216_v10 = vunpack.c.l.bf16 %v195_v7 }
 0x15c   :  { %v199_v55 = vmul.f32 %v198_v54, %v193_v48 }
 0x15e   :  { %v200_v56 = vpack.c.bf16 %v199_v55, %v199_v55 }
 0x160   :  { %v201_v57 = vunpack.c.l.bf16 %v200_v56 }
 0x162   :  { %v202_v58 = vmul.f32 0.044677734, %v201_v57 }
 0x164   :  { %v203_v59 = vpack.c.bf16 %v202_v58, %v202_v58 }
 0x166   :  { %v204_v60 = vunpack.c.l.bf16 %v203_v59 }
 0x168   :  { %v205_v61 = vadd.f32 %v204_v60, %v193_v48 }
 0x16a   :  { %v206_v62 = vpack.c.bf16 %v205_v61, %v205_v61 }
 0x16c   :  { %v207_v63 = vunpack.c.l.bf16 %v206_v62 }
 0x16e   :  { %v208_v0 = vmul.f32 0.796875, %v207_v63 }
 0x170   :  { %v209_v1 = vpack.c.bf16 %v208_v0, %v208_v0 }
 0x172   :  { %v210_v2 = vunpack.c.l.bf16 %v209_v1 }
 0x174   :  { %357 = vtanh.f32 %v210_v2 }
 0x17a   :  { %v358_v3 = vpop.eup %357 }
 0x17b   :  { %v212_v5 = vpack.c.bf16 %v358_v3, %v358_v3 }
 0x17d   :  { %v213_v6 = vunpack.c.l.bf16 %v212_v5 }
 0x17f   :  { %v214_v8 = vadd.f32 1.0, %v213_v6 }
 0x181   :  { %v215_v9 = vpack.c.bf16 %v214_v8, %v214_v8 }
 0x183   :  { %v217_v11 = vunpack.c.l.bf16 %v215_v9 }
 0x185   :  { %v218_v12 = vmul.f32 %v217_v11, %v216_v10 }
 0x187   :  { %v219_v13 = vpack.c.bf16 %v218_v12, %v218_v12 }
 0x189   :  { %335 = vmatmul.msk.bf16.vlgmr.msra.gmra.mxu2 %vm95_vm0, %v219_v13 }
 0x20c   :  { %v268_v15 = vpop.f32.mrf.mxu2 }
 0x20d   :  { %v269_v16 = vadd.f32 %v354_v14, %v268_v15 }
 0x20f   :  { %v272_v17 = vsub.f32 0.0, %v269_v16 }
 0x211   :  { %v273_v18 = vmul.f32 1.442695, %v272_v17 }
 0x213   :  { %359 = vpow2.f32 %v273_v18 }
 0x214   :  { %v270_v19 = vpop.f32.mrf.mxu2 }
 0x219   :  { %v360_v20 = vpop.eup %359 }
 0x21a   :  { %v275_v21 = vadd.f32 1.0, %v360_v20 }
 0x21c   :  { %361 = vrcp.f32 %v275_v21 }
 0x222   :  { %v362_v22 = vpop.eup %361 }
 0x223   :  { %278 = vst.msk [vmem:[%s511_s7] sm:$0xff] %vm277_vm1, %v362_v22 }
 0x224   :  { %283 = vsyncpa [#allocation3], 1 }
 0x225   :  { %284 = vsyncpa [#allocation5], 1 }

</bundles_post_ra>
